<compile_context>
chip_gen: v6e
topology: v6e:2x2x1
jax: 0.10.0
libtpu: 0.0.40
codegen_flags: <defaults>
</compile_context>

<pallas_src>
import functools

import jax
import jax.numpy as jnp
from jax import lax
from jax.experimental import pallas as pl
from jax.experimental.pallas import tpu as pltpu


# ----------------------------- Pallas kernel ------------------------------- #
def _decoder_kernel(n_pts,
                    x_ref, w1_ref, b1_ref, w2_ref, b2_ref, w3_ref, b3_ref,
                    out_ref):
    def leaky(v):                       # nn.LeakyReLU default slope = 0.01
        return jnp.where(v > 0, v, 0.01 * v)

    x = x_ref[...]

    # Fused (points || cuboid) MLP: Linear -> LeakyReLU -> Linear -> LeakyReLU
    # -> Linear -> Sigmoid, all branch-concatenated along the output lanes.
    h = leaky(jnp.dot(x, w1_ref[...], preferred_element_type=jnp.float32) + b1_ref[...])
    h = leaky(jnp.dot(h, w2_ref[...], preferred_element_type=jnp.float32) + b2_ref[...])
    z = jax.nn.sigmoid(
        jnp.dot(h, w3_ref[...], preferred_element_type=jnp.float32) + b3_ref[...])
    # z: (tb, 3N+128). lanes [0,3N) = points (coordinate-major), lanes
    # [3N,3N+3) = cuboid scale, remaining pad lanes = sigmoid(0) (ignored).

    tb = z.shape[0]
    n3 = 3 * n_pts
    pts = z[:, :n3]                     # aligned 128-lane slices (3N = k*128)
    tail = z[:, n3:]                    # (tb, 128): cuboid in lanes 0..2

    # ---- inlier/outlier cuboid distance reduction (pure VPU, unrolled) ----
    ind_sum = jnp.zeros((tb, n_pts), jnp.float32)
    inlier_min = None
    outlier_max = None
    for c in range(3):                  # static unrolled loop over 3 coords
        xc = pts[:, c * n_pts:(c + 1) * n_pts]                    # (tb, N)
        cv = jnp.broadcast_to(tail[:, c:c + 1], (tb, n_pts))      # 1 bcast/coord
        dist2 = jnp.abs(cv - xc)
        m = xc <= cv                                              # inlier mask
        ind_sum = ind_sum + m.astype(jnp.float32)
        pmin = jnp.minimum(xc, dist2)
        pmax = jnp.where(m, 0.0, jnp.maximum(xc, dist2))
        if c == 0:
            inlier_min, outlier_max = pmin, pmax
        else:
            inlier_min = jnp.minimum(inlier_min, pmin)
            outlier_max = jnp.maximum(outlier_max, pmax)

    indicator = (ind_sum > 2.5).astype(jnp.float32)               # (tb, N)
    minn = inlier_min * indicator + (1.0 - indicator) * outlier_max
    dist = jnp.sum(minn, axis=-1, keepdims=True) * jnp.float32(1.0 / n_pts)

    # ---- single lane-dense packed store: z in lanes [0, 3N+64), mean dist
    # ---- broadcast into lanes [3N+64, 3N+128).
    out_w = n3 + 128
    lane = lax.broadcasted_iota(jnp.int32, (tb, out_w), 1)
    out_ref[...] = jnp.where(lane < n3 + 64, z,
                             jnp.broadcast_to(dist, (tb, out_w)))


# ------------------------------ wrapper ------------------------------------ #
def decoder_fc_with_cuboic(x, params, output_pts):
    """x: (bz, latent_dim) float32. Returns (pts, minn_tot_dist, cuboic_x, cuboic_R)."""
    bz, latent_dim = x.shape
    (w1, b1, w2, b2, w3, b3, cw1, cb1, cw2, cb2, cw3, cb3) = params
    h1 = w1.shape[1]
    h2 = w2.shape[1]
    n3 = 3 * output_pts
    out_w = n3 + 128

    # ---- branch-fused weights (built wrapper-side, tiny) ----
    W1 = jnp.concatenate([w1, cw1], axis=1)                   # (latent, 2*h1)
    B1 = jnp.concatenate([b1, cb1], axis=1)                   # (1, 2*h1)
    W2 = jnp.zeros((2 * h1, 2 * h2), jnp.float32)
    W2 = W2.at[:h1, :h2].set(w2).at[h1:, h2:].set(cw2)        # blockdiag
    B2 = jnp.concatenate([b2, cb2], axis=1)                   # (1, 2*h2)
    W3 = jnp.zeros((2 * h2, out_w), jnp.float32)
    W3 = W3.at[:h2, :n3].set(w3).at[h2:, n3:n3 + 3].set(cw3)  # blockdiag + pad
    B3 = jnp.zeros((1, out_w), jnp.float32)
    B3 = B3.at[:, :n3].set(b3).at[:, n3:n3 + 3].set(cb3)

    # ---- batch padding (sublane multiple) and batch tiling ----
    tb = min(((bz + 7) // 8) * 8, 256)
    bz_pad = ((bz + tb - 1) // tb) * tb
    xp = x if bz_pad == bz else jnp.pad(x, ((0, bz_pad - bz), (0, 0)))
    grid = (bz_pad // tb,)

    def w_spec(arr):                    # weights/biases stay resident
        return pl.BlockSpec(arr.shape, lambda i: (0, 0))

    flops = 2 * bz_pad * (latent_dim * 2 * h1 + 2 * h1 * 2 * h2 + 2 * h2 * out_w) \
        + 12 * bz_pad * n3
    transcendentals = bz_pad * out_w    # sigmoid lanes
    bytes_accessed = 4 * (xp.size + W1.size + B1.size + W2.size + B2.size
                          + W3.size + B3.size + bz_pad * out_w)

    out = pl.pallas_call(
        functools.partial(_decoder_kernel, output_pts),
        out_shape=jax.ShapeDtypeStruct((bz_pad, out_w), jnp.float32),
        grid=grid,
        in_specs=[
            pl.BlockSpec((tb, latent_dim), lambda i: (i, 0)),
            w_spec(W1), w_spec(B1), w_spec(W2), w_spec(B2), w_spec(W3), w_spec(B3),
        ],
        out_specs=pl.BlockSpec((tb, out_w), lambda i: (i, 0)),
        compiler_params=pltpu.CompilerParams(dimension_semantics=("parallel",)),
        cost_estimate=pl.CostEstimate(flops=int(flops),
                                      transcendentals=int(transcendentals),
                                      bytes_accessed=int(bytes_accessed)),
    )(xp, W1, B1, W2, B2, W3, B3)

    out = out[:bz]
    pts = out[:, :n3].reshape(bz, 3, output_pts)      # == torch .view(-1, 3, N)
    cuboic_x = out[:, n3:n3 + 3]                      # (bz, 3)
    minn_tot_dist = out[:, n3 + 64]                   # (bz,)
    cuboic_R = jnp.broadcast_to(jnp.eye(3, dtype=jnp.float32), (bz, 3, 3))
    return pts, minn_tot_dist, cuboic_x, cuboic_R


# -------------------------- parameter construction ------------------------- #
def init_params(key, latent_dim, n_features, output_pts):
    """Deterministic nn.Linear-style init. Weights stored transposed (in, out)."""
    def linear(k, fan_in, fan_out):
        k1, k2 = jax.random.split(k)
        bound = 1.0 / jnp.sqrt(fan_in)
        w = jax.random.uniform(k1, (fan_in, fan_out), jnp.float32, -bound, bound)
        b = jax.random.uniform(k2, (1, fan_out), jnp.float32, -bound, bound)
        return w, b

    keys = jax.random.split(key, 6)
    h1, h2 = n_features
    w1, b1 = linear(keys[0], latent_dim, h1)
    w2, b2 = linear(keys[1], h1, h2)
    w3, b3 = linear(keys[2], h2, output_pts * 3)
    cw1, cb1 = linear(keys[3], latent_dim, h1)
    cw2, cb2 = linear(keys[4], h1, h2)
    cw3, cb3 = linear(keys[5], h2, 3)          # pred_rot=False -> 3 outputs
    # TODO(synk): pred_rot=True branch (quaternion -> rotation matrix) not implemented.
    return (w1, b1, w2, b2, w3, b3, cw1, cb1, cw2, cb2, cw3, cb3)


# ------------------------ pure-JAX reference (check) ------------------------ #
def _reference(x, params, output_pts):
    (w1, b1, w2, b2, w3, b3, cw1, cb1, cw2, cb2, cw3, cb3) = params
    lrelu = lambda v: jnp.where(v > 0, v, 0.01 * v)
    h = lrelu(x @ w1 + b1); h = lrelu(h @ w2 + b2)
    pts = jax.nn.sigmoid(h @ w3 + b3).reshape(x.shape[0], 3, output_pts)
    c = lrelu(x @ cw1 + cb1); c = lrelu(c @ cw2 + cb2)
    cub = jax.nn.sigmoid(c @ cw3 + cb3)
    dist2 = jnp.abs(cub[:, :, None] - pts)
    tot = jnp.stack([pts, dist2], axis=-1)
    inl = (pts <= cub[:, :, None]).astype(jnp.float32)
    ind = (inl.sum(1) > 2.5).astype(jnp.float32)
    tot_out = jnp.where(inl[..., None] > 0.5, 0.0, tot)
    outlier = tot_out.max(-1).max(1)
    inlier = tot.min(-1).min(1)
    minn = (inlier * ind + (1.0 - ind) * outlier).mean(-1)
    return pts, minn, cub


# ---------------------------------- main ------------------------------------ #
if __name__ == "__main__":
    bz, latent_dim = 2, 32
    n_features = (32, 32)
    output_pts = 128

    key = jax.random.PRNGKey(0)
    k_x, k_p = jax.random.split(key)
    x = jax.random.normal(k_x, (bz, latent_dim), jnp.float32)
    params = init_params(k_p, latent_dim, n_features, output_pts)

    pts, minn_tot_dist, cuboic_x, cuboic_R = decoder_fc_with_cuboic(x, params, output_pts)
    jax.block_until_ready((pts, minn_tot_dist, cuboic_x, cuboic_R))

    # correctness check against pure-JAX reference
    r_pts, r_minn, r_cub = _reference(x, params, output_pts)
    assert jnp.allclose(pts, r_pts, atol=1e-5)
    assert jnp.allclose(minn_tot_dist, r_minn, atol=1e-5)
    assert jnp.allclose(cuboic_x, r_cub, atol=1e-5)
    assert pts.shape == (bz, 3, output_pts)
    assert minn_tot_dist.shape == (bz,)
    assert cuboic_x.shape == (bz, 3)
    assert cuboic_R.shape == (bz, 3, 3)

    print("KERNEL_OK")
</pallas_src>

<mosaic_0001>
module attributes {stable_mosaic.version = 11 : i64} {
  func.func @_decoder_kernel(%arg0: i32, %arg1: memref<8x32xf32, #tpu.memory_space<vmem>>, %arg2: memref<32x64xf32, #tpu.memory_space<vmem>>, %arg3: memref<1x64xf32, #tpu.memory_space<vmem>>, %arg4: memref<64x64xf32, #tpu.memory_space<vmem>>, %arg5: memref<1x64xf32, #tpu.memory_space<vmem>>, %arg6: memref<64x512xf32, #tpu.memory_space<vmem>>, %arg7: memref<1x512xf32, #tpu.memory_space<vmem>>, %arg8: memref<8x512xf32, #tpu.memory_space<vmem>>) attributes {dimension_semantics = [#tpu.dimension_semantics<parallel>], iteration_bounds = array<i64: 1>, scalar_prefetch = 0 : i64, scratch_operands = 0 : i64, tpu.core_type = #tpu.core_type<tc>, window_params = [{transform_indices = @transform_0, window_bounds = array<i64: 8, 32>}, {pipeline_mode = #tpu.pipeline_mode<synchronous>, transform_indices = @transform_1, window_bounds = array<i64: 32, 64>}, {pipeline_mode = #tpu.pipeline_mode<synchronous>, transform_indices = @transform_2, window_bounds = array<i64: 1, 64>}, {pipeline_mode = #tpu.pipeline_mode<synchronous>, transform_indices = @transform_3, window_bounds = array<i64: 64, 64>}, {pipeline_mode = #tpu.pipeline_mode<synchronous>, transform_indices = @transform_4, window_bounds = array<i64: 1, 64>}, {pipeline_mode = #tpu.pipeline_mode<synchronous>, transform_indices = @transform_5, window_bounds = array<i64: 64, 512>}, {pipeline_mode = #tpu.pipeline_mode<synchronous>, transform_indices = @transform_6, window_bounds = array<i64: 1, 512>}, {transform_indices = @transform_7, window_bounds = array<i64: 8, 512>}]} {
    %c0 = arith.constant 0 : index
    %c0_0 = arith.constant 0 : index
    %0 = vector.load %arg1[%c0, %c0_0] : memref<8x32xf32, #tpu.memory_space<vmem>>, vector<8x32xf32>
    %c0_1 = arith.constant 0 : index
    %c0_2 = arith.constant 0 : index
    %1 = vector.load %arg2[%c0_1, %c0_2] : memref<32x64xf32, #tpu.memory_space<vmem>>, vector<32x64xf32>
    %cst = arith.constant dense<0.000000e+00> : vector<8x64xf32>
    %2 = tpu.matmul %0, %1, %cst {dimension_numbers = #tpu.dot_dimension_numbers<[1], [0], [0], [1], [0, 0, 1, 1], [], []>} : vector<8x32xf32>, vector<32x64xf32>, vector<8x64xf32> -> vector<8x64xf32>
    %c0_3 = arith.constant 0 : index
    %c0_4 = arith.constant 0 : index
    %3 = vector.load %arg3[%c0_3, %c0_4] : memref<1x64xf32, #tpu.memory_space<vmem>>, vector<1x64xf32>
    %4 = vector.broadcast %3 : vector<1x64xf32> to vector<8x64xf32>
    %5 = arith.addf %2, %4 : vector<8x64xf32>
    %cst_5 = arith.constant 0.000000e+00 : f32
    %6 = vector.broadcast %cst_5 : f32 to vector<8x64xf32>
    %7 = arith.cmpf ogt, %5, %6 : vector<8x64xf32>
    %cst_6 = arith.constant 0.00999999977 : f32
    %8 = vector.broadcast %cst_6 : f32 to vector<8x64xf32>
    %9 = arith.mulf %8, %5 : vector<8x64xf32>
    %10 = arith.select %7, %5, %9 : vector<8x64xi1>, vector<8x64xf32>
    %c0_7 = arith.constant 0 : index
    %c0_8 = arith.constant 0 : index
    %11 = vector.load %arg4[%c0_7, %c0_8] : memref<64x64xf32, #tpu.memory_space<vmem>>, vector<64x64xf32>
    %cst_9 = arith.constant dense<0.000000e+00> : vector<8x64xf32>
    %12 = tpu.matmul %10, %11, %cst_9 {dimension_numbers = #tpu.dot_dimension_numbers<[1], [0], [0], [1], [0, 0, 1, 1], [], []>} : vector<8x64xf32>, vector<64x64xf32>, vector<8x64xf32> -> vector<8x64xf32>
    %c0_10 = arith.constant 0 : index
    %c0_11 = arith.constant 0 : index
    %13 = vector.load %arg5[%c0_10, %c0_11] : memref<1x64xf32, #tpu.memory_space<vmem>>, vector<1x64xf32>
    %14 = vector.broadcast %13 : vector<1x64xf32> to vector<8x64xf32>
    %15 = arith.addf %12, %14 : vector<8x64xf32>
    %cst_12 = arith.constant 0.000000e+00 : f32
    %16 = vector.broadcast %cst_12 : f32 to vector<8x64xf32>
    %17 = arith.cmpf ogt, %15, %16 : vector<8x64xf32>
    %cst_13 = arith.constant 0.00999999977 : f32
    %18 = vector.broadcast %cst_13 : f32 to vector<8x64xf32>
    %19 = arith.mulf %18, %15 : vector<8x64xf32>
    %20 = arith.select %17, %15, %19 : vector<8x64xi1>, vector<8x64xf32>
    %c0_14 = arith.constant 0 : index
    %c0_15 = arith.constant 0 : index
    %21 = vector.load %arg6[%c0_14, %c0_15] : memref<64x512xf32, #tpu.memory_space<vmem>>, vector<64x512xf32>
    %cst_16 = arith.constant dense<0.000000e+00> : vector<8x512xf32>
    %22 = tpu.matmul %20, %21, %cst_16 {dimension_numbers = #tpu.dot_dimension_numbers<[1], [0], [0], [1], [0, 0, 1, 1], [], []>} : vector<8x64xf32>, vector<64x512xf32>, vector<8x512xf32> -> vector<8x512xf32>
    %c0_17 = arith.constant 0 : index
    %c0_18 = arith.constant 0 : index
    %23 = vector.load %arg7[%c0_17, %c0_18] : memref<1x512xf32, #tpu.memory_space<vmem>>, vector<1x512xf32>
    %24 = vector.broadcast %23 : vector<1x512xf32> to vector<8x512xf32>
    %25 = arith.addf %22, %24 : vector<8x512xf32>
    %26 = arith.negf %25 : vector<8x512xf32>
    %27 = math.exp %26 : vector<8x512xf32>
    %cst_19 = arith.constant 1.000000e+00 : f32
    %28 = vector.broadcast %cst_19 : f32 to vector<8x512xf32>
    %29 = arith.addf %28, %27 : vector<8x512xf32>
    %30 = arith.divf %28, %29 : vector<8x512xf32>
    %31 = vector.extract_strided_slice %30 {offsets = [0, 0], sizes = [8, 384], strides = [1, 1]} : vector<8x512xf32> to vector<8x384xf32>
    %32 = vector.extract_strided_slice %30 {offsets = [0, 384], sizes = [8, 128], strides = [1, 1]} : vector<8x512xf32> to vector<8x128xf32>
    %cst_20 = arith.constant 0.000000e+00 : f32
    %33 = vector.broadcast %cst_20 : f32 to vector<8x128xf32>
    %34 = vector.extract_strided_slice %31 {offsets = [0, 0], sizes = [8, 128], strides = [1, 1]} : vector<8x384xf32> to vector<8x128xf32>
    %35 = vector.extract_strided_slice %32 {offsets = [0, 0], sizes = [8, 1], strides = [1, 1]} : vector<8x128xf32> to vector<8x1xf32>
    %36 = vector.shape_cast %35 : vector<8x1xf32> to vector<8x1xf32>
    %37 = vector.broadcast %36 : vector<8x1xf32> to vector<8x128xf32>
    %38 = arith.subf %37, %34 : vector<8x128xf32>
    %39 = math.absf %38 : vector<8x128xf32>
    %40 = arith.cmpf ole, %34, %37 : vector<8x128xf32>
    %41 = arith.extui %40 : vector<8x128xi1> to vector<8x128xi32>
    %42 = arith.sitofp %41 : vector<8x128xi32> to vector<8x128xf32>
    %43 = arith.addf %33, %42 : vector<8x128xf32>
    %44 = arith.minimumf %34, %39 : vector<8x128xf32>
    %45 = arith.maximumf %34, %39 : vector<8x128xf32>
    %cst_21 = arith.constant 0.000000e+00 : f32
    %46 = vector.broadcast %cst_21 : f32 to vector<8x128xf32>
    %47 = arith.select %40, %46, %45 : vector<8x128xi1>, vector<8x128xf32>
    %48 = vector.extract_strided_slice %31 {offsets = [0, 128], sizes = [8, 128], strides = [1, 1]} : vector<8x384xf32> to vector<8x128xf32>
    %49 = vector.extract_strided_slice %32 {offsets = [0, 1], sizes = [8, 1], strides = [1, 1]} : vector<8x128xf32> to vector<8x1xf32>
    %50 = vector.shape_cast %49 : vector<8x1xf32> to vector<8x1xf32>
    %51 = vector.broadcast %50 : vector<8x1xf32> to vector<8x128xf32>
    %52 = arith.subf %51, %48 : vector<8x128xf32>
    %53 = math.absf %52 : vector<8x128xf32>
    %54 = arith.cmpf ole, %48, %51 : vector<8x128xf32>
    %55 = arith.extui %54 : vector<8x128xi1> to vector<8x128xi32>
    %56 = arith.sitofp %55 : vector<8x128xi32> to vector<8x128xf32>
    %57 = arith.addf %43, %56 : vector<8x128xf32>
    %58 = arith.minimumf %48, %53 : vector<8x128xf32>
    %59 = arith.maximumf %48, %53 : vector<8x128xf32>
    %cst_22 = arith.constant 0.000000e+00 : f32
    %60 = vector.broadcast %cst_22 : f32 to vector<8x128xf32>
    %61 = arith.select %54, %60, %59 : vector<8x128xi1>, vector<8x128xf32>
    %62 = arith.minimumf %44, %58 : vector<8x128xf32>
    %63 = arith.maximumf %47, %61 : vector<8x128xf32>
    %64 = vector.extract_strided_slice %31 {offsets = [0, 256], sizes = [8, 128], strides = [1, 1]} : vector<8x384xf32> to vector<8x128xf32>
    %65 = vector.extract_strided_slice %32 {offsets = [0, 2], sizes = [8, 1], strides = [1, 1]} : vector<8x128xf32> to vector<8x1xf32>
    %66 = vector.shape_cast %65 : vector<8x1xf32> to vector<8x1xf32>
    %67 = vector.broadcast %66 : vector<8x1xf32> to vector<8x128xf32>
    %68 = arith.subf %67, %64 : vector<8x128xf32>
    %69 = math.absf %68 : vector<8x128xf32>
    %70 = arith.cmpf ole, %64, %67 : vector<8x128xf32>
    %71 = arith.extui %70 : vector<8x128xi1> to vector<8x128xi32>
    %72 = arith.sitofp %71 : vector<8x128xi32> to vector<8x128xf32>
    %73 = arith.addf %57, %72 : vector<8x128xf32>
    %74 = arith.minimumf %64, %69 : vector<8x128xf32>
    %75 = arith.maximumf %64, %69 : vector<8x128xf32>
    %cst_23 = arith.constant 0.000000e+00 : f32
    %76 = vector.broadcast %cst_23 : f32 to vector<8x128xf32>
    %77 = arith.select %70, %76, %75 : vector<8x128xi1>, vector<8x128xf32>
    %78 = arith.minimumf %62, %74 : vector<8x128xf32>
    %79 = arith.maximumf %63, %77 : vector<8x128xf32>
    %cst_24 = arith.constant 2.500000e+00 : f32
    %80 = vector.broadcast %cst_24 : f32 to vector<8x128xf32>
    %81 = arith.cmpf ogt, %73, %80 : vector<8x128xf32>
    %82 = arith.extui %81 : vector<8x128xi1> to vector<8x128xi32>
    %83 = arith.sitofp %82 : vector<8x128xi32> to vector<8x128xf32>
    %84 = arith.mulf %78, %83 : vector<8x128xf32>
    %cst_25 = arith.constant 1.000000e+00 : f32
    %85 = vector.broadcast %cst_25 : f32 to vector<8x128xf32>
    %86 = arith.subf %85, %83 : vector<8x128xf32>
    %87 = arith.mulf %86, %79 : vector<8x128xf32>
    %88 = arith.addf %84, %87 : vector<8x128xf32>
    %cst_26 = arith.constant dense<0.000000e+00> : vector<8xf32>
    %89 = vector.multi_reduction <add>, %88, %cst_26 [1] : vector<8x128xf32> to vector<8xf32>
    %90 = vector.shape_cast %89 : vector<8xf32> to vector<8x1xf32>
    %cst_27 = arith.constant 7.812500e-03 : f32
    %91 = vector.broadcast %cst_27 : f32 to vector<8x1xf32>
    %92 = arith.mulf %90, %91 : vector<8x1xf32>
    %93 = tpu.iota {dimensions = array<i32: 1>} : vector<8x512xi32>
    %c448_i32 = arith.constant 448 : i32
    %94 = vector.broadcast %c448_i32 : i32 to vector<8x512xi32>
    %95 = arith.cmpi slt, %93, %94 : vector<8x512xi32>
    %96 = vector.shape_cast %92 : vector<8x1xf32> to vector<8x1xf32>
    %97 = vector.broadcast %96 : vector<8x1xf32> to vector<8x512xf32>
    %98 = arith.select %95, %30, %97 : vector<8x512xi1>, vector<8x512xf32>
    %c0_28 = arith.constant 0 : index
    %c0_29 = arith.constant 0 : index
    %99 = vector.load %arg8[%c0_28, %c0_29] : memref<8x512xf32, #tpu.memory_space<vmem>>, vector<8x512xf32>
    tpu.vector_store %arg8[%c0_28, %c0_29], %98 {strides = array<i32>} : memref<8x512xf32, #tpu.memory_space<vmem>>, vector<8x512xf32>,
    return
  }
  func.func @transform_0(%arg0: i32) -> (i32, i32) {
    %c0_i32 = arith.constant 0 : i32
    %c0_i32_0 = arith.constant 0 : i32
    return %arg0, %c0_i32 : i32, i32
  }
  func.func @transform_1(%arg0: i32) -> (i32, i32) {
    %c0_i32 = arith.constant 0 : i32
    %c0_i32_0 = arith.constant 0 : i32
    %c0_i32_1 = arith.constant 0 : i32
    return %c0_i32, %c0_i32_0 : i32, i32
  }
  func.func @transform_2(%arg0: i32) -> (i32, i32) {
    %c0_i32 = arith.constant 0 : i32
    %c0_i32_0 = arith.constant 0 : i32
    %c0_i32_1 = arith.constant 0 : i32
    return %c0_i32, %c0_i32_0 : i32, i32
  }
  func.func @transform_3(%arg0: i32) -> (i32, i32) {
    %c0_i32 = arith.constant 0 : i32
    %c0_i32_0 = arith.constant 0 : i32
    %c0_i32_1 = arith.constant 0 : i32
    return %c0_i32, %c0_i32_0 : i32, i32
  }
  func.func @transform_4(%arg0: i32) -> (i32, i32) {
    %c0_i32 = arith.constant 0 : i32
    %c0_i32_0 = arith.constant 0 : i32
    %c0_i32_1 = arith.constant 0 : i32
    return %c0_i32, %c0_i32_0 : i32, i32
  }
  func.func @transform_5(%arg0: i32) -> (i32, i32) {
    %c0_i32 = arith.constant 0 : i32
    %c0_i32_0 = arith.constant 0 : i32
    %c0_i32_1 = arith.constant 0 : i32
    return %c0_i32, %c0_i32_0 : i32, i32
  }
  func.func @transform_6(%arg0: i32) -> (i32, i32) {
    %c0_i32 = arith.constant 0 : i32
    %c0_i32_0 = arith.constant 0 : i32
    %c0_i32_1 = arith.constant 0 : i32
    return %c0_i32, %c0_i32_0 : i32, i32
  }
  func.func @transform_7(%arg0: i32) -> (i32, i32) {
    %c0_i32 = arith.constant 0 : i32
    %c0_i32_0 = arith.constant 0 : i32
    return %arg0, %c0_i32 : i32, i32
  }
}

</mosaic_0001>

<bundles_post_ra>
// kernel: tpu_custom_call.1
= control target key start
LH: loop header
LB: loop body
LE: loop exit
PB: predicated region body
PF: predicated region fallthrough
CT: control target
= control target key end

     0   :  { %12 = vsyncpa [#allocation3], 0  ;;  %s879_s0 = inlined_call_operand.hbm [shape: f32[8,32], index: 0, kind: input, shape index: {}]   ;;  %s880_s1 = inlined_call_operand.hbm [shape: f32[32,64], index: 1, kind: input, shape index: {}]   ;;  %s881_s2 = inlined_call_operand.vmem [shape: f32[1,64], index: 2, kind: input, shape index: {}]   ;;  %s882_s3 = inlined_call_operand.hbm [shape: f32[64,64], index: 3, kind: input, shape index: {}]   ;;  %s883_s4 = inlined_call_operand.vmem [shape: f32[1,64], index: 4, kind: input, shape index: {}]   ;;  %s884_s5 = inlined_call_operand.hbm [shape: f32[64,512], index: 5, kind: input, shape index: {}]   ;;  %s885_s6 = inlined_call_operand.vmem [shape: f32[1,512], index: 6, kind: input, shape index: {}]   ;;  %s886_s7 = inlined_call_operand.hbm [shape: f32[8,512], index: 7, kind: output, shape index: {}]  }
   0x1   :  { %13 = vsyncpa [#allocation6], 0 }
   0x2   :  { %14 = vsyncpa [#allocation9], 0 }
   0x3   :  { %15 = vsyncpa [#allocation4], 0  ;;  %s772_s24 = smov [#allocation5]  }
   0x4   :  { %s31_s25 = sshll.u32 %s772_s24, 4  ;;  %s32_s25 = int_to_ptr.vmem [resolvable:$true] %s31_s25 }
   0x5   :  { %s672_s26 = scalar_lea.vmem %s32_s25, 512  ;;  %p677_p1 = scmp.lt.s32.totalorder %s32_s25, %s32_s25 }
   0x6   :  { %p673_p0 = scmp.ne.s32.totalorder %s32_s25, %s672_s26  ;;  %p678_p2 = scmp.lt.s32.totalorder %s672_s26, %s672_s26 }
   0x8   :  { %p679_p3 = por %p678_p2, %p677_p1 }
   0xa   :  { %p680_p4 = pnand %p679_p3, %p673_p0 }
   0xc   :  { %683 = shalt.err (!%p680_p4)
}
   0xd   :  { %s773_s27 = smov 128   ;;  %s774_s28 = smov 8  }
   0xe   :  { %37 = dma.hbm_to_vmem [thread:$0]  %s880_s1, 512, %s32_s25, [#allocation6], %s773_s27, %s773_s27, %s774_s28  }
   0xf   :  { %s775_s8 = smov [#allocation2]   ;;  %s776_s10 = smov [#allocation7]  }
  0x10   :  { %s22_s9 = sshll.u32 %s775_s8, 4  ;;  %s45_s11 = sshll.u32 %s776_s10, 4  ;;  %s23_s9 = int_to_ptr.vmem [resolvable:$true] %s22_s9  ;;  %s46_s11 = int_to_ptr.vmem [resolvable:$true] %s45_s11 }
  0x11   :  { %s692_s12 = scalar_lea.vmem %s23_s9, 128  ;;  %p697_p6 = scmp.lt.s32.totalorder %s23_s9, %s23_s9 }
  0x12   :  { %p693_p5 = scmp.ne.s32.totalorder %s23_s9, %s692_s12  ;;  %p698_p7 = scmp.lt.s32.totalorder %s692_s12, %s692_s12 }
  0x14   :  { %p699_p8 = por %p698_p7, %p697_p6 }
  0x16   :  { %p700_p9 = pnand %p699_p8, %p693_p5 }
  0x18   :  { %703 = shalt.err (!%p700_p9)
}
  0x19   :  { %25 = dma.hbm_to_vmem [thread:$0]  %s879_s0, 128, %s23_s9, [#allocation3]  }
  0x1a   :  { %s712_s15 = scalar_lea.vmem %s46_s11, 1024  ;;  %p717_p11 = scmp.lt.s32.totalorder %s46_s11, %s46_s11 }
  0x1b   :  { %p713_p10 = scmp.ne.s32.totalorder %s46_s11, %s712_s15  ;;  %p718_p12 = scmp.lt.s32.totalorder %s712_s15, %s712_s15 }
  0x1d   :  { %p719_p13 = por %p718_p12, %p717_p11 }
  0x1f   :  { %p720_p0 = pnand %p719_p13, %p713_p10 }
  0x21   :  { %723 = shalt.err (!%p720_p0)
}
  0x22   :  { %51 = dma.hbm_to_vmem [thread:$0]  %s882_s3, 1024, %s46_s11, [#allocation6], %s773_s27, %s773_s27, %s774_s28  }
  0x23   :  { %s777_s17 = smov [#allocation8]  }
  0x24   :  { %s59_s18 = sshll.u32 %s777_s17, 4  ;;  %s60_s18 = int_to_ptr.vmem [resolvable:$true] %s59_s18 }
  0x25   :  { %s732_s19 = scalar_lea.vmem %s60_s18, 4096  ;;  %p737_p2 = scmp.lt.s32.totalorder %s60_s18, %s60_s18 }
  0x26   :  { %p733_p1 = scmp.ne.s32.totalorder %s60_s18, %s732_s19  ;;  %p738_p3 = scmp.lt.s32.totalorder %s732_s19, %s732_s19 }
  0x28   :  { %p739_p4 = por %p738_p3, %p737_p2 }
  0x2a   :  { %p740_p5 = pnand %p739_p4, %p733_p1 }
  0x2c   :  { %743 = shalt.err (!%p740_p5)
}
  0x2d   :  { %s778_s0 = smov 512   ;;  %s779_s20 = smov 32  }
  0x2e   :  { %65 = dma.hbm_to_vmem [thread:$0]  %s884_s5, 4096, %s60_s18, [#allocation9], %s778_s0, %s778_s0, %s779_s20  }
  0x2f   :  { %764 = dma.done.wait [#allocation3], 128  }
  0x30   :  { %765 = vsyncadd [#allocation3], 4294967168 }
  0x31   :  { %766 = dma.done.wait [#allocation6], 1536  }
  0x32   :  { %767 = vsyncadd [#allocation6], 4294965760 }
  0x33   :  { %768 = dma.done.wait [#allocation9], 4096  }
  0x34   :  { %769 = vsyncadd [#allocation9], 4294963200  ;;  %v780_v0 = vmov 0.0   ;;  %vm781_vm0 = vmmov 0   ;;  %v84_v1 = vld [vmem:[#allocation5 + $0x18] sm:$0xff]  ;;  %v83_v2 = vld [vmem:[#allocation5 + $0x10] sm:$0xff]  ;;  %v295_v60 = vlaneseq }
  0x35   :  { %600 = vmatprep.subr.mxu0 %v780_v0  ;;  %608 = vmatprep.mubr.msk.f32.mxu0 %vm781_vm0, %v780_v0  ;;  %v176_v3 = vld [vmem:[#allocation7 + $0x38] sm:$0xff]  ;;  %v82_v4 = vld [vmem:[#allocation5 + $0x8] sm:$0xff]  ;;  %v175_v5 = vld [vmem:[#allocation7 + $0x30] sm:$0xff]  ;;  %vm92_vm1 = vcmask 261120   ;;  %vm184_vm3 = vcmask 523264   ;;  %v782_v58 = vmov 2  }
  0x36   :  { %611 = vmatprep.subr.mxu1 %v780_v0  ;;  %627 = vmatprep.mubr.msk.f32.mxu1 %vm781_vm0, %v780_v0  ;;  %v174_v6 = vld [vmem:[#allocation7 + $0x28] sm:$0xff]  ;;  %v81_v7 = vld [vmem:[#allocation5] sm:$0xff]  ;;  %v80_v8 = vld [vmem:[#allocation2] sm:$0xff]  ;;  %v783_v59 = vmov 0   ;;  %v296_v61 = vshrl.u32 %v295_v60, 7 }
  0x37   :  { %601 = vmatpush3.msra.mxu0 %v84_v1  ;;  %612 = vmatpush3.msra.mxu1 %v176_v3  ;;  %v173_v9 = vld [vmem:[#allocation7 + $0x20] sm:$0xff]  ;;  %v172_v10 = vld [vmem:[#allocation7 + $0x18] sm:$0xff]  ;;  %v171_v11 = vld [vmem:[#allocation7 + $0x10] sm:$0xff] }
  0x38   :  { %602 = vmatprep.subr.mxu0 %v780_v0  ;;  %613 = vmatprep.subr.mxu1 %v780_v0  ;;  %v170_v12 = vld [vmem:[#allocation7 + $0x8] sm:$0xff]  ;;  %v169_v13 = vld [vmem:[#allocation7] sm:$0xff]  ;;  %v292_v15 = vld [vmem:[#allocation8 + $0xf8] sm:$0xff]  ;;  %v297_v62 = vsub.s32 0, %v296_v61  ;;  %v305_v63 = vsub.s32 2, %v296_v61  ;;  %v309_v3 = vsub.s32 3, %v296_v61 }
  0x39   :  { %603 = vmatpush3.msra.mxu0 %v83_v2  ;;  %614 = vmatpush3.msra.mxu1 %v175_v5  ;;  %v290_v14 = vld [vmem:[#allocation8 + $0xe8] sm:$0xff]  ;;  %v289_v16 = vld [vmem:[#allocation8 + $0xe0] sm:$0xff]  ;;  %v572_v25 = vld [vmem:[%s881_s2] ss:$0 sm:$0xff]  ;;  %v301_v2 = vsub.s32 1, %v296_v61 }
  0x3a   :  { %604 = vmatprep.subr.mxu0 %v780_v0  ;;  %615 = vmatprep.subr.mxu1 %v780_v0  ;;  %v286_v17 = vld [vmem:[#allocation8 + $0xc8] sm:$0xff]  ;;  %v285_v18 = vld [vmem:[#allocation8 + $0xc0] sm:$0xff]  ;;  %v291_v30 = vld [vmem:[#allocation8 + $0xf0] sm:$0xff] }
  0x3b   :  { %605 = vmatpush3.msra.mxu0 %v82_v4  ;;  %616 = vmatpush3.msra.mxu1 %v174_v6  ;;  %v282_v19 = vld [vmem:[#allocation8 + $0xa8] sm:$0xff]  ;;  %v281_v20 = vld [vmem:[#allocation8 + $0xa0] sm:$0xff]  ;;  %v288_v32 = vld [vmem:[#allocation8 + $0xd8] sm:$0xff] }
  0x3c   :  { %606 = vmatprep.subr.mxu0 %v780_v0  ;;  %617 = vmatprep.subr.mxu1 %v780_v0  ;;  %v278_v21 = vld [vmem:[#allocation8 + $0x88] sm:$0xff]  ;;  %v277_v22 = vld [vmem:[#allocation8 + $0x80] sm:$0xff]  ;;  %v287_v33 = vld [vmem:[#allocation8 + $0xd0] sm:$0xff] }
  0x3d   :  { %607 = vmatpush3.msra.mxu0 %v81_v7  ;;  %618 = vmatpush3.msra.mxu1 %v173_v9  ;;  %v274_v23 = vld [vmem:[#allocation8 + $0x68] sm:$0xff]  ;;  %v273_v24 = vld [vmem:[#allocation8 + $0x60] sm:$0xff]  ;;  %v284_v34 = vld [vmem:[#allocation8 + $0xb8] sm:$0xff] }
  0x3e   :  { %609 = vmatmul.mubr.msk.f32.vlgmr.msra.gmra.mxu0 %vm92_vm1, %v80_v8  ;;  %619 = vmatprep.subr.mxu1 %v780_v0  ;;  %v283_v35 = vld [vmem:[#allocation8 + $0xb0] sm:$0xff]  ;;  %v280_v36 = vld [vmem:[#allocation8 + $0x98] sm:$0xff]  ;;  %v270_v40 = vld [vmem:[#allocation8 + $0x48] sm:$0xff] }
  0x3f   :  { %382 = vmatprep.mubr.f32.mxu0 %v780_v0  ;;  %620 = vmatpush3.msra.mxu1 %v172_v10  ;;  %v279_v37 = vld [vmem:[#allocation8 + $0x90] sm:$0xff]  ;;  %v276_v38 = vld [vmem:[#allocation8 + $0x78] sm:$0xff]  ;;  %v269_v42 = vld [vmem:[#allocation8 + $0x40] sm:$0xff] }
  0x40   :  { %621 = vmatprep.subr.mxu1 %v780_v0  ;;  %334 = vmatprep.subr.mxu0 %v290_v14  ;;  %v275_v39 = vld [vmem:[#allocation8 + $0x70] sm:$0xff]  ;;  %v272_v41 = vld [vmem:[#allocation8 + $0x58] sm:$0xff]  ;;  %v266_v44 = vld [vmem:[#allocation8 + $0x28] sm:$0xff] }
  0x41   :  { %622 = vmatpush3.msra.mxu1 %v171_v11  ;;  %335 = vmatpush1.msra.mxu0 %v289_v16  ;;  %v271_v43 = vld [vmem:[#allocation8 + $0x50] sm:$0xff]  ;;  %v268_v45 = vld [vmem:[#allocation8 + $0x38] sm:$0xff]  ;;  %v265_v46 = vld [vmem:[#allocation8 + $0x20] sm:$0xff] }
  0x42   :  { %623 = vmatprep.subr.mxu1 %v780_v0  ;;  %336 = vmatprep.subr.mxu0 %v286_v17  ;;  %v267_v47 = vld [vmem:[#allocation8 + $0x30] sm:$0xff]  ;;  %v262_v48 = vld [vmem:[#allocation8 + $0x8] sm:$0xff]  ;;  %v264_v49 = vld [vmem:[#allocation8 + $0x18] sm:$0xff] }
  0x43   :  { %624 = vmatpush3.msra.mxu1 %v170_v12  ;;  %337 = vmatpush1.msra.mxu0 %v285_v18  ;;  %v261_v50 = vld [vmem:[#allocation8] sm:$0xff]  ;;  %v263_v51 = vld [vmem:[#allocation8 + $0x10] sm:$0xff]  ;;  %v574_v52 = vld [vmem:[%s883_s4] ss:$0 sm:$0xff] }
  0x44   :  { %625 = vmatprep.subr.mxu1 %v780_v0  ;;  %338 = vmatprep.subr.mxu0 %v282_v19  ;;  %v293_v1 = vld [vmem:[%s885_s6] sm:$0xf]  ;;  %s785_s6 = smov [#allocation10]  }
  0x45   :  { %626 = vmatpush3.msra.mxu1 %v169_v13  ;;  %339 = vmatpush1.msra.mxu0 %v281_v20  ;;  %v298_v4 = vrot.slane %v293_v1, %v297_v62  ;;  %v306_v5 = vrot.slane %v293_v1, %v305_v63  ;;  %v302_v6 = vrot.slane %v293_v1, %v301_v2  ;;  %s561_s25 = sshll.u32 %s785_s6, 4  ;;  %s562_s25 = int_to_ptr.vmem [resolvable:$true] %s561_s25 }
  0x46   :  { %405 = vmatprep.subr.mxu1 %v292_v15  ;;  %340 = vmatprep.subr.mxu0 %v278_v21  ;;  %v310_v7 = vrot.slane %v293_v1, %v309_v3  ;;  %v539_v3 = vand.u32 127, %v295_v60  ;;  %s744_s26 = scalar_lea.vmem %s562_s25, 512  ;;  %p749_p7 = scmp.lt.s32.totalorder %s562_s25, %s562_s25 }
  0x47   :  { %341 = vmatpush1.msra.mxu0 %v277_v22  ;;  %646 = vset.pattern.permute.xlu1 %v782_v58  ;;  %p745_p6 = scmp.ne.s32.totalorder %s562_s25, %s744_s26  ;;  %p750_p8 = scmp.lt.s32.totalorder %s744_s26, %s744_s26 }
  0x48   :  { %342 = vmatprep.subr.mxu0 %v274_v23  ;;  %644 = vset.pattern.permute.xlu0 %v783_v59 }
  0x49   :  { %343 = vmatpush1.msra.mxu0 %v273_v24  ;;  %p751_p9 = por %p750_p8, %p749_p7 }
  0x4a   :  { %344 = vmatprep.subr.mxu0 %v270_v40 }
  0x4b   :  { %345 = vmatpush1.msra.mxu0 %v269_v42  ;;  %p752_p10 = pnand %p751_p9, %p745_p6 }
  0x4c   :  { %346 = vmatprep.subr.mxu0 %v266_v44 }
  0x4d   :  { %347 = vmatpush1.msra.mxu0 %v265_v46 }
  0x4e   :  { %348 = vmatprep.subr.mxu0 %v262_v48 }
  0x4f   :  { %349 = vmatpush1.msra.mxu0 %v261_v50 }
  0xfe   :  { %v162_v26 = vpop.f32.mrf.mxu0 }
  0xff   :  { %v163_v27 = vadd.f32 %v572_v25, %v162_v26 }
 0x100   :  { %v610_v28 = vpop.f32.mrf.mxu0 }
 0x101   :  { %vm166_vm2 = vcmp.gt.f32.partialorder %v163_v27, 0.0  ;;  %v167_v29 = vmul.f32 0.01, %v163_v27 }
 0x103   :  { %v168_v31 = vsel %vm166_vm2, %v163_v27, %v167_v29 }
 0x104   :  { %628 = vmatmul.mubr.msk.f32.vlgmr.msra.gmra.mxu1 %vm184_vm3, %v168_v31 }
 0x105   :  { %406 = vmatpush1.msra.mxu1 %v291_v30  ;;  %453 = vmatprep.mubr.f32.mxu1 %v780_v0 }
 0x106   :  { %407 = vmatprep.subr.mxu1 %v288_v32  ;;  %v784_v32 = vmov 1  }
 0x107   :  { %408 = vmatpush1.msra.mxu1 %v287_v33 }
 0x108   :  { %409 = vmatprep.subr.mxu1 %v284_v34 }
 0x109   :  { %410 = vmatpush1.msra.mxu1 %v283_v35 }
 0x10a   :  { %411 = vmatprep.subr.mxu1 %v280_v36 }
 0x10b   :  { %412 = vmatpush1.msra.mxu1 %v279_v37 }
 0x10c   :  { %413 = vmatprep.subr.mxu1 %v276_v38 }
 0x10d   :  { %414 = vmatpush1.msra.mxu1 %v275_v39 }
 0x10e   :  { %415 = vmatprep.subr.mxu1 %v272_v41 }
 0x10f   :  { %416 = vmatpush1.msra.mxu1 %v271_v43 }
 0x110   :  { %417 = vmatprep.subr.mxu1 %v268_v45 }
 0x111   :  { %418 = vmatpush1.msra.mxu1 %v267_v47 }
 0x112   :  { %419 = vmatprep.subr.mxu1 %v264_v49 }
 0x113   :  { %420 = vmatpush1.msra.mxu1 %v263_v51 }
 0x1c4   :  { %v254_v53 = vpop.f32.mrf.mxu1 }
 0x1c5   :  { %v255_v54 = vadd.f32 %v574_v52, %v254_v53 }
 0x1c6   :  { %v629_v55 = vpop.f32.mrf.mxu1 }
 0x1c7   :  { %vm258_vm4 = vcmp.gt.f32.partialorder %v255_v54, 0.0  ;;  %v259_v56 = vmul.f32 0.01, %v255_v54 }
 0x1c9   :  { %v260_v57 = vsel %vm258_vm4, %v255_v54, %v259_v56 }
 0x1ca   :  { %576 = vmatmul.mubr.msk.f32.vlgmr.msra.gmra.mxu0 %vm184_vm3, %v260_v57  ;;  %577 = vmatmul.mubr.msk.f32.vlgmr.msra.gmra.mxu1 %vm184_vm3, %v260_v57 }
 0x28a   :  { %v384_v8 = vpop.f32.mrf.mxu0  ;;  %v455_v9 = vpop.f32.mrf.mxu1 }
 0x28b   :  { %v385_v10 = vadd.f32 %v384_v8, %v298_v4  ;;  %v456_v11 = vadd.f32 %v455_v9, %v306_v5  ;;  %v542_v4 = vadd.s32 384, %v539_v3 }
 0x28c   :  { %v386_v12 = vpop.f32.mrf.mxu0  ;;  %v457_v13 = vpop.f32.mrf.mxu1 }
 0x28d   :  { %v578_v14 = vmul.f32 -1.442695, %v385_v10  ;;  %v580_v15 = vmul.f32 -1.442695, %v456_v11  ;;  %v387_v16 = vadd.f32 %v386_v12, %v302_v6  ;;  %v458_v17 = vadd.f32 %v457_v13, %v310_v7 }
 0x28e   :  { %vm546_vm9 = vcmp.lt.s32.totalorder %v542_v4, 448 }
 0x28f   :  { %648 = vpow2.f32 %v578_v14  ;;  %v579_v18 = vmul.f32 -1.442695, %v387_v16  ;;  %v581_v19 = vmul.f32 -1.442695, %v458_v17 }
 0x290   :  { %650 = vpow2.f32 %v580_v15 }
 0x291   :  { %652 = vpow2.f32 %v579_v18 }
 0x292   :  { %654 = vpow2.f32 %v581_v19 }
 0x29c   :  { %v649_v20 = vpop.eup %648 }
 0x29d   :  { %v651_v21 = vpop.eup %650  ;;  %v472_v22 = vadd.f32 1.0, %v649_v20 }
 0x29e   :  { %v653_v23 = vpop.eup %652  ;;  %v474_v24 = vadd.f32 1.0, %v651_v21 }
 0x29f   :  { %v655_v25 = vpop.eup %654  ;;  %656 = vrcp.f32 %v472_v22  ;;  %v473_v26 = vadd.f32 1.0, %v653_v23 }
 0x2a0   :  { %658 = vrcp.f32 %v474_v24  ;;  %v475_v27 = vadd.f32 1.0, %v655_v25 }
 0x2a1   :  { %660 = vrcp.f32 %v473_v26 }
 0x2a2   :  { %662 = vrcp.f32 %v475_v27 }
 0x2ac   :  { %v657_v28 = vpop.eup %656 }
 0x2ad   :  { %v659_v29 = vpop.eup %658  ;;  %551 = vst [vmem:[#allocation10] sm:$0xff] %v657_v28 }
 0x2ae   :  { %v661_v30 = vpop.eup %660  ;;  %553 = vst [vmem:[#allocation10 + $0x10] sm:$0xff] %v659_v29 }
 0x2af   :  { %v663_v31 = vpop.eup %662  ;;  %552 = vst [vmem:[#allocation10 + $0x8] sm:$0xff] %v661_v30 }
 0x2b0   :  { %514 = vperm.xlu1 %646, %v663_v31   ;;  %486 = vperm.xlu0 %644, %v663_v31  }
 0x2b4   :  { %645 = vset.pattern.permute.xlu0 %v784_v32 }
 0x2b5   :  { %499 = vperm.xlu0 %645, %v663_v31  }
 0x2b9   :  { %647 = vset.pattern.permute.xlu0 %v782_v58 }
 0x32b   :  { %v515_v33 = vpop.permute.xlu1 %514  ;;  %v487_v34 = vpop.permute.xlu0 %486 }
 0x32c   :  { %v517_v35 = vsub.f32 %v515_v33, %v659_v29  ;;  %v489_v36 = vsub.f32 %v487_v34, %v657_v28  ;;  %vm491_vm5 = vcmp.le.f32.partialorder %v657_v28, %v487_v34  ;;  %vm519_vm6 = vcmp.le.f32.partialorder %v659_v29, %v515_v33 }
 0x32d   :  { %v582_v41 = vsel %vm491_vm5, 1.0, %v780_v0  ;;  %v584_v46 = vsel %vm519_vm6, 1.0, %v780_v0 }
 0x32e   :  { %v490_v37 = vand.u32 2147483647, %v489_v36  ;;  %v518_v38 = vand.u32 2147483647, %v517_v35 }
 0x330   :  { %v500_v39 = vpop.permute.xlu0 %499  ;;  %v496_v43 = vmax.f32 %v657_v28, %v490_v37  ;;  %v524_v47 = vmax.f32 %v659_v29, %v518_v38  ;;  %v495_v48 = vmin.f32 %v657_v28, %v490_v37  ;;  %v523_v52 = vmin.f32 %v659_v29, %v518_v38 }
 0x331   :  { %v502_v40 = vsub.f32 %v500_v39, %v661_v30  ;;  %vm504_vm7 = vcmp.le.f32.partialorder %v661_v30, %v500_v39 }
 0x332   :  { %v583_v42 = vsel %vm504_vm7, 1.0, %v780_v0  ;;  %v497_v53 = vsel %vm491_vm5, 0.0, %v496_v43  ;;  %v525_v58 = vsel %vm519_vm6, 0.0, %v524_v47 }
 0x333   :  { %v503_v44 = vand.u32 2147483647, %v502_v40  ;;  %v507_v45 = vadd.f32 %v583_v42, %v582_v41 }
 0x335   :  { %v508_v49 = vmin.f32 %v661_v30, %v503_v44  ;;  %v509_v50 = vmax.f32 %v661_v30, %v503_v44  ;;  %v522_v51 = vadd.f32 %v584_v46, %v507_v45 }
 0x337   :  { %v510_v54 = vsel %vm504_vm7, 0.0, %v509_v50  ;;  %v511_v55 = vmin.f32 %v495_v48, %v508_v49  ;;  %vm528_vm8 = vcmp.gt.f32.partialorder %v522_v51, 2.5 }
 0x338   :  { %v512_v56 = vmax.f32 %v497_v53, %v510_v54  ;;  %v585_v57 = vsel %vm528_vm8, 1.0, %v780_v0 }
 0x339   :  { %v526_v59 = vmin.f32 %v511_v55, %v523_v52  ;;  %v532_v61 = vsub.f32 1.0, %v585_v57 }
 0x33a   :  { %v527_v62 = vmax.f32 %v512_v56, %v525_v58 }
 0x33b   :  { %v531_v63 = vmul.f32 %v585_v57, %v526_v59 }
 0x33c   :  { %v533_v1 = vmul.f32 %v532_v61, %v527_v62 }
 0x33e   :  { %v534_v2 = vadd.f32 %v533_v1, %v531_v63 }
 0x340   :  { %535 = vadd.xlane.f32.xlu1 %v534_v2 }
 0x3c9   :  { %v536_v5 = vpop.xlane.xlu1 %535 }
 0x3ca   :  { %v537_v6 = vmul.f32 0.0078125, %v536_v5 }
 0x3cc   :  { %v550_v7 = vsel %vm546_vm9, %v663_v31, %v537_v6 }
 0x3cd   :  { %554 = vst [vmem:[#allocation10 + $0x18] sm:$0xff] %v550_v7 }
 0x3ce   :  { %755 = shalt.err (!%p752_p10)
}
 0x3cf   :  { %564 = dma.vmem_to_hbm [thread:$0]  %s562_s25, 512, %s886_s7, [#allocation4]  }
 0x3d0   :  { %770 = dma.done.wait [#allocation4], 512  }
 0x3d1   :  { %771 = vsyncadd [#allocation4], 4294966784 }
 0x3d2   :  { %568 = vsyncpa [#allocation3], 1 }
 0x3d3   :  { %569 = vsyncpa [#allocation6], 1 }
 0x3d4   :  { %570 = vsyncpa [#allocation9], 1 }
 0x3d5   :  { %571 = vsyncpa [#allocation4], 1 }

</bundles_post_ra>
